<compile_context>
chip_gen: v6e
topology: v6e:2x2x1
jax: 0.10.0
libtpu: 0.0.40
codegen_flags: <defaults>
</compile_context>

<pallas_src>
import jax
import jax.numpy as jnp
from jax.experimental import pallas as pl
from jax.experimental.pallas import tpu as pltpu

# synthetic config (model_name='vanilla_rnn', rnn_bidirectional=False,
# rnn_num_layers=1, rnn_dropout=0.0, dataset_name='mitbih')
HIDDEN = 32          # cfg['rnn_hidden_size']
SEQ = 8              # sequence length T
BATCH = 2            # batch size B
NUM_CLASSES = 5      # mitbih
DENSE2 = 64

# packed-slab row offsets
_R_WIH = 0      # rows 0:8    W_ih padded to (8, H); only row 0 is nonzero
_R_BRNN = 8     # row  8      b_ih + b_hh                (H lanes)
_R_W1 = 9       # row  9      dense1 weight              (H lanes)
_R_B1 = 10      # row 10      dense1 bias                (lane 0)
_R_B2 = 11      # row 11      dense2 bias                (64 lanes)
_R_B3 = 12      # row 12      dense3 bias                (C lanes, rest zero)
_R_WHH = 16     # rows 16:48  W_hh^T                     (32, 32)
_R_W2 = 48      # rows 48:80  W2^T                       (32, 64)
_R_W3 = 80      # rows 80:144 W3^T                       (64, C), rest zero
_SLAB_ROWS = 144


def shared_mlp_over_rnn_kernel(x_ref, slab_ref, out_ref):
    # x_ref:    (T*B, 8)   f32  time-major input; column 0 = signal, cols 1..7 zero
    # slab_ref: (144, 128) f32  packed weights (see pack_params)
    # out_ref:  (B, 128)   f32  lane-dense logits; columns 0..C-1 valid, rest zero
    B = out_ref.shape[0]
    T = x_ref.shape[0] // B
    H, D2 = HIDDEN, DENSE2

    # ---- unpack the packed weight slab (static slices, zero extra DMAs) ----
    w_ih8  = slab_ref[_R_WIH:_R_WIH + 8, 0:H]          # (8, H)
    b_rnn  = slab_ref[_R_BRNN:_R_BRNN + 1, 0:H]        # (1, H)   b_ih + b_hh
    w1     = slab_ref[_R_W1:_R_W1 + 1, 0:H]            # (1, H)   dense1 weight
    b1     = slab_ref[_R_B1:_R_B1 + 1, 0:1]            # (1, 1)   dense1 bias
    b2     = slab_ref[_R_B2:_R_B2 + 1, 0:D2]           # (1, 64)  dense2 bias
    b3     = slab_ref[_R_B3:_R_B3 + 1, :]              # (1, 128) dense3 bias (padded)
    w_hh_t = slab_ref[_R_WHH:_R_WHH + H, 0:H]          # (32, 32) recurrent W^T
    w2t    = slab_ref[_R_W2:_R_W2 + H, 0:D2]           # (32, 64) dense2 W^T
    w3t    = slab_ref[_R_W3:_R_W3 + D2, :]             # (64, 128) dense3 W^T (padded)

    # ---- hoisted input projection: one MXU matmul covers all T steps ----
    # h_t = tanh(x_t W_ih^T + b_ih + h_{t-1} W_hh^T + b_hh)
    xin_all = jnp.dot(x_ref[...], w_ih8,
                      preferred_element_type=jnp.float32) + b_rnn    # (T*B, H)

    # recurrent weight held in bf16 -> single-pass MXU matmul per step
    w_hh_bf = w_hh_t.astype(jnp.bfloat16)

    # ---- fully unrolled recurrence with fused online-softmax attention pooling ----
    h = jnp.zeros((B, H), dtype=jnp.float32)
    m = z = pooled = None
    for t in range(T):
        h = jnp.tanh(xin_all[t * B:(t + 1) * B, :]
                     + jnp.dot(h.astype(jnp.bfloat16), w_hh_bf,
                               preferred_element_type=jnp.float32))
        hr = jnp.maximum(h, 0.0)                                      # relu(hiddens)
        # o_t = relu(dense1(hr_t))  -> attention score, (B, 1)
        s = jnp.maximum(jnp.sum(hr * w1, axis=-1, keepdims=True) + b1, 0.0)
        if t == 0:
            m = s                         # running max
            z = jnp.ones_like(s)          # running sum of exp(s - m)
            pooled = hr                   # running un-normalized weighted sum
        else:
            m_new = jnp.maximum(m, s)
            alpha = jnp.exp(m - m_new)    # rescale factor for previous accumulators
            e = jnp.exp(s - m_new)
            z = alpha * z + e
            pooled = alpha * pooled + e * hr
            m = m_new

    # deferred softmax normalization: pooled = sum_t softmax(o)_t * hr_t
    pooled = pooled * pl.reciprocal(z, approx=True)                   # (B, H)

    # ---- dense2 + relu, dense3 (lane-dense padded logits) ----
    x2 = jnp.maximum(
        jnp.dot(pooled, w2t, preferred_element_type=jnp.float32) + b2, 0.0)   # (B, 64)
    out_ref[...] = jnp.dot(x2, w3t, preferred_element_type=jnp.float32) + b3  # (B, 128)


def pack_params(params):
    """Pack all 10 tiny operands into ONE tile-aligned (144, 128) slab.

    Call once at weight-load time (NOT on the per-inference path)."""
    w_ih, w_hh, b_ih, b_hh, w1, b1, w2, b2, w3, b3 = params
    H = w_hh.shape[0]
    D2 = w2.shape[0]
    C = w3.shape[0]

    slab = jnp.zeros((_SLAB_ROWS, 128), jnp.float32)
    slab = slab.at[_R_WIH, :H].set(w_ih.reshape(H).astype(jnp.float32))
    slab = slab.at[_R_BRNN, :H].set((b_ih + b_hh).astype(jnp.float32))
    slab = slab.at[_R_W1, :H].set(w1.reshape(H).astype(jnp.float32))
    slab = slab.at[_R_B1, 0].set(b1.reshape(()).astype(jnp.float32))
    slab = slab.at[_R_B2, :D2].set(b2.astype(jnp.float32))
    slab = slab.at[_R_B3, :C].set(b3.astype(jnp.float32))
    slab = slab.at[_R_WHH:_R_WHH + H, :H].set(w_hh.T.astype(jnp.float32))
    slab = slab.at[_R_W2:_R_W2 + H, :D2].set(w2.T.astype(jnp.float32))
    slab = slab.at[_R_W3:_R_W3 + D2, :C].set(w3.T.astype(jnp.float32))
    return slab


def shared_mlp_over_rnn(x, slab):
    """x: (B, T, 1) batch-first, like the PyTorch module. slab: pack_params(params)."""
    B, T, _ = x.shape

    # Time-major (T*B, 1), zero-padded to K=8 so the input projection is one
    # ordinary MXU matmul inside the kernel (no per-step lane broadcasts).
    x_tm = jnp.transpose(x, (1, 0, 2)).reshape(T * B, 1).astype(jnp.float32)
    x_tm = jnp.pad(x_tm, ((0, 0), (0, 7)))                    # (T*B, 8)

    vmem = pl.BlockSpec(memory_space=pltpu.MemorySpace.VMEM)  # whole-array blocks
    # No grid: the whole problem is one tiny program (2 input DMAs, 1 output DMA).
    out_padded = pl.pallas_call(
        shared_mlp_over_rnn_kernel,
        out_shape=jax.ShapeDtypeStruct((B, 128), jnp.float32),   # lane-dense output
        in_specs=[vmem, vmem],
        out_specs=vmem,
    )(x_tm, slab)
    return out_padded[:, :NUM_CLASSES]


def reference(x, params):
    """Pure-JAX reference matching the PyTorch forward semantics."""
    w_ih, w_hh, b_ih, b_hh, w1, b1, w2, b2, w3, b3 = params
    B, T, _ = x.shape
    h = jnp.zeros((B, HIDDEN), dtype=jnp.float32)
    hs = []
    for t in range(T):
        h = jnp.tanh(x[:, t, :] @ w_ih.T + b_ih + h @ w_hh.T + b_hh)
        hs.append(h)
    hiddens = jax.nn.relu(jnp.stack(hs, axis=1))            # (B, T, H)
    o = jax.nn.relu(hiddens @ w1.T + b1)                    # (B, T, 1)
    att = jax.nn.softmax(o, axis=1)
    pooled = jnp.sum(hiddens * att, axis=1)                 # (B, H)
    x2 = jax.nn.relu(pooled @ w2.T + b2)
    return x2 @ w3.T + b3


def init_params(key):
    """Deterministic init mimicking PyTorch default uniform(-1/sqrt(fan), +1/sqrt(fan))."""
    ks = jax.random.split(key, 10)
    u = lambda k, shape, fan: jax.random.uniform(
        k, shape, jnp.float32, -1.0 / jnp.sqrt(fan), 1.0 / jnp.sqrt(fan))
    w_ih = u(ks[0], (HIDDEN, 1), HIDDEN)
    w_hh = u(ks[1], (HIDDEN, HIDDEN), HIDDEN)
    b_ih = u(ks[2], (HIDDEN,), HIDDEN)
    b_hh = u(ks[3], (HIDDEN,), HIDDEN)
    w1 = u(ks[4], (1, HIDDEN), HIDDEN)
    b1 = u(ks[5], (1,), HIDDEN)
    w2 = u(ks[6], (DENSE2, HIDDEN), HIDDEN)
    b2 = u(ks[7], (DENSE2,), HIDDEN)
    w3 = u(ks[8], (NUM_CLASSES, DENSE2), DENSE2)
    b3 = u(ks[9], (NUM_CLASSES,), DENSE2)
    return (w_ih, w_hh, b_ih, b_hh, w1, b1, w2, b2, w3, b3)


if __name__ == "__main__":
    key = jax.random.PRNGKey(0)
    kx, kp = jax.random.split(key)
    x = jax.random.normal(kx, (BATCH, SEQ, 1), dtype=jnp.float32)
    params = init_params(kp)

    # One-time weight packing (weight-load time), off the per-inference path.
    slab = jax.block_until_ready(pack_params(params))

    fwd = jax.jit(shared_mlp_over_rnn)
    out = jax.block_until_ready(fwd(x, slab))

    ref = reference(x, params)
    assert out.shape == (BATCH, NUM_CLASSES)
    assert jnp.all(jnp.isfinite(out))
    assert jnp.allclose(out, ref, rtol=5e-2, atol=5e-2), (out, ref)
    print("KERNEL_OK")
</pallas_src>

<mosaic_0001>
module attributes {stable_mosaic.version = 11 : i64} {
  func.func @shared_mlp_over_rnn_kernel(%arg0: memref<16x8xf32, #tpu.memory_space<vmem>>, %arg1: memref<144x128xf32, #tpu.memory_space<vmem>>, %arg2: memref<2x128xf32, #tpu.memory_space<vmem>>) attributes {dimension_semantics = [], scalar_prefetch = 0 : i64, scratch_operands = 0 : i64, tpu.core_type = #tpu.core_type<tc>} {
    %c0 = arith.constant 0 : index
    %c0_0 = arith.constant 0 : index
    %0 = vector.load %arg1[%c0, %c0_0] : memref<144x128xf32, #tpu.memory_space<vmem>>, vector<8x32xf32>
    %c8 = arith.constant 8 : index
    %c0_1 = arith.constant 0 : index
    %1 = vector.load %arg1[%c8, %c0_1] : memref<144x128xf32, #tpu.memory_space<vmem>>, vector<1x32xf32>
    %c9 = arith.constant 9 : index
    %c0_2 = arith.constant 0 : index
    %2 = vector.load %arg1[%c9, %c0_2] : memref<144x128xf32, #tpu.memory_space<vmem>>, vector<1x32xf32>
    %c10 = arith.constant 10 : index
    %c0_3 = arith.constant 0 : index
    %3 = vector.load %arg1[%c10, %c0_3] : memref<144x128xf32, #tpu.memory_space<vmem>>, vector<1x1xf32>
    %c11 = arith.constant 11 : index
    %c0_4 = arith.constant 0 : index
    %4 = vector.load %arg1[%c11, %c0_4] : memref<144x128xf32, #tpu.memory_space<vmem>>, vector<1x64xf32>
    %c12 = arith.constant 12 : index
    %c0_5 = arith.constant 0 : index
    %5 = vector.load %arg1[%c12, %c0_5] : memref<144x128xf32, #tpu.memory_space<vmem>>, vector<1x128xf32>
    %c16 = arith.constant 16 : index
    %c0_6 = arith.constant 0 : index
    %6 = vector.load %arg1[%c16, %c0_6] : memref<144x128xf32, #tpu.memory_space<vmem>>, vector<32x32xf32>
    %c48 = arith.constant 48 : index
    %c0_7 = arith.constant 0 : index
    %7 = vector.load %arg1[%c48, %c0_7] : memref<144x128xf32, #tpu.memory_space<vmem>>, vector<32x64xf32>
    %c80 = arith.constant 80 : index
    %c0_8 = arith.constant 0 : index
    %8 = vector.load %arg1[%c80, %c0_8] : memref<144x128xf32, #tpu.memory_space<vmem>>, vector<64x128xf32>
    %c0_9 = arith.constant 0 : index
    %c0_10 = arith.constant 0 : index
    %9 = vector.load %arg0[%c0_9, %c0_10] : memref<16x8xf32, #tpu.memory_space<vmem>>, vector<16x8xf32>
    %cst = arith.constant dense<0.000000e+00> : vector<16x32xf32>
    %10 = tpu.matmul %9, %0, %cst {dimension_numbers = #tpu.dot_dimension_numbers<[1], [0], [0], [1], [0, 0, 1, 1], [], []>} : vector<16x8xf32>, vector<8x32xf32>, vector<16x32xf32> -> vector<16x32xf32>
    %11 = vector.broadcast %1 : vector<1x32xf32> to vector<16x32xf32>
    %12 = arith.addf %10, %11 : vector<16x32xf32>
    %13 = arith.truncf %6 : vector<32x32xf32> to vector<32x32xbf16>
    %cst_11 = arith.constant 0.000000e+00 : f32
    %14 = vector.broadcast %cst_11 : f32 to vector<2x32xf32>
    %15 = vector.extract_strided_slice %12 {offsets = [0, 0], sizes = [2, 32], strides = [1, 1]} : vector<16x32xf32> to vector<2x32xf32>
    %16 = arith.truncf %14 : vector<2x32xf32> to vector<2x32xbf16>
    %cst_12 = arith.constant dense<0.000000e+00> : vector<2x32xf32>
    %17 = tpu.matmul %16, %13, %cst_12 {dimension_numbers = #tpu.dot_dimension_numbers<[1], [0], [0], [1], [0, 0, 1, 1], [], []>} : vector<2x32xbf16>, vector<32x32xbf16>, vector<2x32xf32> -> vector<2x32xf32>
    %18 = arith.addf %15, %17 : vector<2x32xf32>
    %19 = math.tanh %18 : vector<2x32xf32>
    %cst_13 = arith.constant 0.000000e+00 : f32
    %20 = vector.broadcast %cst_13 : f32 to vector<2x32xf32>
    %21 = arith.maximumf %19, %20 : vector<2x32xf32>
    %22 = vector.broadcast %2 : vector<1x32xf32> to vector<2x32xf32>
    %23 = arith.mulf %21, %22 : vector<2x32xf32>
    %cst_14 = arith.constant dense<0.000000e+00> : vector<2xf32>
    %24 = vector.multi_reduction <add>, %23, %cst_14 [1] : vector<2x32xf32> to vector<2xf32>
    %25 = vector.shape_cast %24 : vector<2xf32> to vector<2x1xf32>
    %26 = vector.broadcast %3 : vector<1x1xf32> to vector<2x1xf32>
    %27 = arith.addf %25, %26 : vector<2x1xf32>
    %cst_15 = arith.constant 0.000000e+00 : f32
    %28 = vector.broadcast %cst_15 : f32 to vector<2x1xf32>
    %29 = arith.maximumf %27, %28 : vector<2x1xf32>
    %cst_16 = arith.constant 1.000000e+00 : f32
    %30 = vector.broadcast %cst_16 : f32 to vector<2x1xf32>
    %31 = vector.extract_strided_slice %12 {offsets = [2, 0], sizes = [2, 32], strides = [1, 1]} : vector<16x32xf32> to vector<2x32xf32>
    %32 = arith.truncf %19 : vector<2x32xf32> to vector<2x32xbf16>
    %cst_17 = arith.constant dense<0.000000e+00> : vector<2x32xf32>
    %33 = tpu.matmul %32, %13, %cst_17 {dimension_numbers = #tpu.dot_dimension_numbers<[1], [0], [0], [1], [0, 0, 1, 1], [], []>} : vector<2x32xbf16>, vector<32x32xbf16>, vector<2x32xf32> -> vector<2x32xf32>
    %34 = arith.addf %31, %33 : vector<2x32xf32>
    %35 = math.tanh %34 : vector<2x32xf32>
    %cst_18 = arith.constant 0.000000e+00 : f32
    %36 = vector.broadcast %cst_18 : f32 to vector<2x32xf32>
    %37 = arith.maximumf %35, %36 : vector<2x32xf32>
    %38 = vector.broadcast %2 : vector<1x32xf32> to vector<2x32xf32>
    %39 = arith.mulf %37, %38 : vector<2x32xf32>
    %cst_19 = arith.constant dense<0.000000e+00> : vector<2xf32>
    %40 = vector.multi_reduction <add>, %39, %cst_19 [1] : vector<2x32xf32> to vector<2xf32>
    %41 = vector.shape_cast %40 : vector<2xf32> to vector<2x1xf32>
    %42 = vector.broadcast %3 : vector<1x1xf32> to vector<2x1xf32>
    %43 = arith.addf %41, %42 : vector<2x1xf32>
    %cst_20 = arith.constant 0.000000e+00 : f32
    %44 = vector.broadcast %cst_20 : f32 to vector<2x1xf32>
    %45 = arith.maximumf %43, %44 : vector<2x1xf32>
    %46 = arith.maximumf %29, %45 : vector<2x1xf32>
    %47 = arith.subf %29, %46 : vector<2x1xf32>
    %48 = math.exp %47 : vector<2x1xf32>
    %49 = arith.subf %45, %46 : vector<2x1xf32>
    %50 = math.exp %49 : vector<2x1xf32>
    %51 = arith.mulf %48, %30 : vector<2x1xf32>
    %52 = arith.addf %51, %50 : vector<2x1xf32>
    %53 = vector.broadcast %48 : vector<2x1xf32> to vector<2x32xf32>
    %54 = arith.mulf %53, %21 : vector<2x32xf32>
    %55 = vector.broadcast %50 : vector<2x1xf32> to vector<2x32xf32>
    %56 = arith.mulf %55, %37 : vector<2x32xf32>
    %57 = arith.addf %54, %56 : vector<2x32xf32>
    %58 = vector.extract_strided_slice %12 {offsets = [4, 0], sizes = [2, 32], strides = [1, 1]} : vector<16x32xf32> to vector<2x32xf32>
    %59 = arith.truncf %35 : vector<2x32xf32> to vector<2x32xbf16>
    %cst_21 = arith.constant dense<0.000000e+00> : vector<2x32xf32>
    %60 = tpu.matmul %59, %13, %cst_21 {dimension_numbers = #tpu.dot_dimension_numbers<[1], [0], [0], [1], [0, 0, 1, 1], [], []>} : vector<2x32xbf16>, vector<32x32xbf16>, vector<2x32xf32> -> vector<2x32xf32>
    %61 = arith.addf %58, %60 : vector<2x32xf32>
    %62 = math.tanh %61 : vector<2x32xf32>
    %cst_22 = arith.constant 0.000000e+00 : f32
    %63 = vector.broadcast %cst_22 : f32 to vector<2x32xf32>
    %64 = arith.maximumf %62, %63 : vector<2x32xf32>
    %65 = vector.broadcast %2 : vector<1x32xf32> to vector<2x32xf32>
    %66 = arith.mulf %64, %65 : vector<2x32xf32>
    %cst_23 = arith.constant dense<0.000000e+00> : vector<2xf32>
    %67 = vector.multi_reduction <add>, %66, %cst_23 [1] : vector<2x32xf32> to vector<2xf32>
    %68 = vector.shape_cast %67 : vector<2xf32> to vector<2x1xf32>
    %69 = vector.broadcast %3 : vector<1x1xf32> to vector<2x1xf32>
    %70 = arith.addf %68, %69 : vector<2x1xf32>
    %cst_24 = arith.constant 0.000000e+00 : f32
    %71 = vector.broadcast %cst_24 : f32 to vector<2x1xf32>
    %72 = arith.maximumf %70, %71 : vector<2x1xf32>
    %73 = arith.maximumf %46, %72 : vector<2x1xf32>
    %74 = arith.subf %46, %73 : vector<2x1xf32>
    %75 = math.exp %74 : vector<2x1xf32>
    %76 = arith.subf %72, %73 : vector<2x1xf32>
    %77 = math.exp %76 : vector<2x1xf32>
    %78 = arith.mulf %75, %52 : vector<2x1xf32>
    %79 = arith.addf %78, %77 : vector<2x1xf32>
    %80 = vector.broadcast %75 : vector<2x1xf32> to vector<2x32xf32>
    %81 = arith.mulf %80, %57 : vector<2x32xf32>
    %82 = vector.broadcast %77 : vector<2x1xf32> to vector<2x32xf32>
    %83 = arith.mulf %82, %64 : vector<2x32xf32>
    %84 = arith.addf %81, %83 : vector<2x32xf32>
    %85 = vector.extract_strided_slice %12 {offsets = [6, 0], sizes = [2, 32], strides = [1, 1]} : vector<16x32xf32> to vector<2x32xf32>
    %86 = arith.truncf %62 : vector<2x32xf32> to vector<2x32xbf16>
    %cst_25 = arith.constant dense<0.000000e+00> : vector<2x32xf32>
    %87 = tpu.matmul %86, %13, %cst_25 {dimension_numbers = #tpu.dot_dimension_numbers<[1], [0], [0], [1], [0, 0, 1, 1], [], []>} : vector<2x32xbf16>, vector<32x32xbf16>, vector<2x32xf32> -> vector<2x32xf32>
    %88 = arith.addf %85, %87 : vector<2x32xf32>
    %89 = math.tanh %88 : vector<2x32xf32>
    %cst_26 = arith.constant 0.000000e+00 : f32
    %90 = vector.broadcast %cst_26 : f32 to vector<2x32xf32>
    %91 = arith.maximumf %89, %90 : vector<2x32xf32>
    %92 = vector.broadcast %2 : vector<1x32xf32> to vector<2x32xf32>
    %93 = arith.mulf %91, %92 : vector<2x32xf32>
    %cst_27 = arith.constant dense<0.000000e+00> : vector<2xf32>
    %94 = vector.multi_reduction <add>, %93, %cst_27 [1] : vector<2x32xf32> to vector<2xf32>
    %95 = vector.shape_cast %94 : vector<2xf32> to vector<2x1xf32>
    %96 = vector.broadcast %3 : vector<1x1xf32> to vector<2x1xf32>
    %97 = arith.addf %95, %96 : vector<2x1xf32>
    %cst_28 = arith.constant 0.000000e+00 : f32
    %98 = vector.broadcast %cst_28 : f32 to vector<2x1xf32>
    %99 = arith.maximumf %97, %98 : vector<2x1xf32>
    %100 = arith.maximumf %73, %99 : vector<2x1xf32>
    %101 = arith.subf %73, %100 : vector<2x1xf32>
    %102 = math.exp %101 : vector<2x1xf32>
    %103 = arith.subf %99, %100 : vector<2x1xf32>
    %104 = math.exp %103 : vector<2x1xf32>
    %105 = arith.mulf %102, %79 : vector<2x1xf32>
    %106 = arith.addf %105, %104 : vector<2x1xf32>
    %107 = vector.broadcast %102 : vector<2x1xf32> to vector<2x32xf32>
    %108 = arith.mulf %107, %84 : vector<2x32xf32>
    %109 = vector.broadcast %104 : vector<2x1xf32> to vector<2x32xf32>
    %110 = arith.mulf %109, %91 : vector<2x32xf32>
    %111 = arith.addf %108, %110 : vector<2x32xf32>
    %112 = vector.extract_strided_slice %12 {offsets = [8, 0], sizes = [2, 32], strides = [1, 1]} : vector<16x32xf32> to vector<2x32xf32>
    %113 = arith.truncf %89 : vector<2x32xf32> to vector<2x32xbf16>
    %cst_29 = arith.constant dense<0.000000e+00> : vector<2x32xf32>
    %114 = tpu.matmul %113, %13, %cst_29 {dimension_numbers = #tpu.dot_dimension_numbers<[1], [0], [0], [1], [0, 0, 1, 1], [], []>} : vector<2x32xbf16>, vector<32x32xbf16>, vector<2x32xf32> -> vector<2x32xf32>
    %115 = arith.addf %112, %114 : vector<2x32xf32>
    %116 = math.tanh %115 : vector<2x32xf32>
    %cst_30 = arith.constant 0.000000e+00 : f32
    %117 = vector.broadcast %cst_30 : f32 to vector<2x32xf32>
    %118 = arith.maximumf %116, %117 : vector<2x32xf32>
    %119 = vector.broadcast %2 : vector<1x32xf32> to vector<2x32xf32>
    %120 = arith.mulf %118, %119 : vector<2x32xf32>
    %cst_31 = arith.constant dense<0.000000e+00> : vector<2xf32>
    %121 = vector.multi_reduction <add>, %120, %cst_31 [1] : vector<2x32xf32> to vector<2xf32>
    %122 = vector.shape_cast %121 : vector<2xf32> to vector<2x1xf32>
    %123 = vector.broadcast %3 : vector<1x1xf32> to vector<2x1xf32>
    %124 = arith.addf %122, %123 : vector<2x1xf32>
    %cst_32 = arith.constant 0.000000e+00 : f32
    %125 = vector.broadcast %cst_32 : f32 to vector<2x1xf32>
    %126 = arith.maximumf %124, %125 : vector<2x1xf32>
    %127 = arith.maximumf %100, %126 : vector<2x1xf32>
    %128 = arith.subf %100, %127 : vector<2x1xf32>
    %129 = math.exp %128 : vector<2x1xf32>
    %130 = arith.subf %126, %127 : vector<2x1xf32>
    %131 = math.exp %130 : vector<2x1xf32>
    %132 = arith.mulf %129, %106 : vector<2x1xf32>
    %133 = arith.addf %132, %131 : vector<2x1xf32>
    %134 = vector.broadcast %129 : vector<2x1xf32> to vector<2x32xf32>
    %135 = arith.mulf %134, %111 : vector<2x32xf32>
    %136 = vector.broadcast %131 : vector<2x1xf32> to vector<2x32xf32>
    %137 = arith.mulf %136, %118 : vector<2x32xf32>
    %138 = arith.addf %135, %137 : vector<2x32xf32>
    %139 = vector.extract_strided_slice %12 {offsets = [10, 0], sizes = [2, 32], strides = [1, 1]} : vector<16x32xf32> to vector<2x32xf32>
    %140 = arith.truncf %116 : vector<2x32xf32> to vector<2x32xbf16>
    %cst_33 = arith.constant dense<0.000000e+00> : vector<2x32xf32>
    %141 = tpu.matmul %140, %13, %cst_33 {dimension_numbers = #tpu.dot_dimension_numbers<[1], [0], [0], [1], [0, 0, 1, 1], [], []>} : vector<2x32xbf16>, vector<32x32xbf16>, vector<2x32xf32> -> vector<2x32xf32>
    %142 = arith.addf %139, %141 : vector<2x32xf32>
    %143 = math.tanh %142 : vector<2x32xf32>
    %cst_34 = arith.constant 0.000000e+00 : f32
    %144 = vector.broadcast %cst_34 : f32 to vector<2x32xf32>
    %145 = arith.maximumf %143, %144 : vector<2x32xf32>
    %146 = vector.broadcast %2 : vector<1x32xf32> to vector<2x32xf32>
    %147 = arith.mulf %145, %146 : vector<2x32xf32>
    %cst_35 = arith.constant dense<0.000000e+00> : vector<2xf32>
    %148 = vector.multi_reduction <add>, %147, %cst_35 [1] : vector<2x32xf32> to vector<2xf32>
    %149 = vector.shape_cast %148 : vector<2xf32> to vector<2x1xf32>
    %150 = vector.broadcast %3 : vector<1x1xf32> to vector<2x1xf32>
    %151 = arith.addf %149, %150 : vector<2x1xf32>
    %cst_36 = arith.constant 0.000000e+00 : f32
    %152 = vector.broadcast %cst_36 : f32 to vector<2x1xf32>
    %153 = arith.maximumf %151, %152 : vector<2x1xf32>
    %154 = arith.maximumf %127, %153 : vector<2x1xf32>
    %155 = arith.subf %127, %154 : vector<2x1xf32>
    %156 = math.exp %155 : vector<2x1xf32>
    %157 = arith.subf %153, %154 : vector<2x1xf32>
    %158 = math.exp %157 : vector<2x1xf32>
    %159 = arith.mulf %156, %133 : vector<2x1xf32>
    %160 = arith.addf %159, %158 : vector<2x1xf32>
    %161 = vector.broadcast %156 : vector<2x1xf32> to vector<2x32xf32>
    %162 = arith.mulf %161, %138 : vector<2x32xf32>
    %163 = vector.broadcast %158 : vector<2x1xf32> to vector<2x32xf32>
    %164 = arith.mulf %163, %145 : vector<2x32xf32>
    %165 = arith.addf %162, %164 : vector<2x32xf32>
    %166 = vector.extract_strided_slice %12 {offsets = [12, 0], sizes = [2, 32], strides = [1, 1]} : vector<16x32xf32> to vector<2x32xf32>
    %167 = arith.truncf %143 : vector<2x32xf32> to vector<2x32xbf16>
    %cst_37 = arith.constant dense<0.000000e+00> : vector<2x32xf32>
    %168 = tpu.matmul %167, %13, %cst_37 {dimension_numbers = #tpu.dot_dimension_numbers<[1], [0], [0], [1], [0, 0, 1, 1], [], []>} : vector<2x32xbf16>, vector<32x32xbf16>, vector<2x32xf32> -> vector<2x32xf32>
    %169 = arith.addf %166, %168 : vector<2x32xf32>
    %170 = math.tanh %169 : vector<2x32xf32>
    %cst_38 = arith.constant 0.000000e+00 : f32
    %171 = vector.broadcast %cst_38 : f32 to vector<2x32xf32>
    %172 = arith.maximumf %170, %171 : vector<2x32xf32>
    %173 = vector.broadcast %2 : vector<1x32xf32> to vector<2x32xf32>
    %174 = arith.mulf %172, %173 : vector<2x32xf32>
    %cst_39 = arith.constant dense<0.000000e+00> : vector<2xf32>
    %175 = vector.multi_reduction <add>, %174, %cst_39 [1] : vector<2x32xf32> to vector<2xf32>
    %176 = vector.shape_cast %175 : vector<2xf32> to vector<2x1xf32>
    %177 = vector.broadcast %3 : vector<1x1xf32> to vector<2x1xf32>
    %178 = arith.addf %176, %177 : vector<2x1xf32>
    %cst_40 = arith.constant 0.000000e+00 : f32
    %179 = vector.broadcast %cst_40 : f32 to vector<2x1xf32>
    %180 = arith.maximumf %178, %179 : vector<2x1xf32>
    %181 = arith.maximumf %154, %180 : vector<2x1xf32>
    %182 = arith.subf %154, %181 : vector<2x1xf32>
    %183 = math.exp %182 : vector<2x1xf32>
    %184 = arith.subf %180, %181 : vector<2x1xf32>
    %185 = math.exp %184 : vector<2x1xf32>
    %186 = arith.mulf %183, %160 : vector<2x1xf32>
    %187 = arith.addf %186, %185 : vector<2x1xf32>
    %188 = vector.broadcast %183 : vector<2x1xf32> to vector<2x32xf32>
    %189 = arith.mulf %188, %165 : vector<2x32xf32>
    %190 = vector.broadcast %185 : vector<2x1xf32> to vector<2x32xf32>
    %191 = arith.mulf %190, %172 : vector<2x32xf32>
    %192 = arith.addf %189, %191 : vector<2x32xf32>
    %193 = vector.extract_strided_slice %12 {offsets = [14, 0], sizes = [2, 32], strides = [1, 1]} : vector<16x32xf32> to vector<2x32xf32>
    %194 = arith.truncf %170 : vector<2x32xf32> to vector<2x32xbf16>
    %cst_41 = arith.constant dense<0.000000e+00> : vector<2x32xf32>
    %195 = tpu.matmul %194, %13, %cst_41 {dimension_numbers = #tpu.dot_dimension_numbers<[1], [0], [0], [1], [0, 0, 1, 1], [], []>} : vector<2x32xbf16>, vector<32x32xbf16>, vector<2x32xf32> -> vector<2x32xf32>
    %196 = arith.addf %193, %195 : vector<2x32xf32>
    %197 = math.tanh %196 : vector<2x32xf32>
    %cst_42 = arith.constant 0.000000e+00 : f32
    %198 = vector.broadcast %cst_42 : f32 to vector<2x32xf32>
    %199 = arith.maximumf %197, %198 : vector<2x32xf32>
    %200 = vector.broadcast %2 : vector<1x32xf32> to vector<2x32xf32>
    %201 = arith.mulf %199, %200 : vector<2x32xf32>
    %cst_43 = arith.constant dense<0.000000e+00> : vector<2xf32>
    %202 = vector.multi_reduction <add>, %201, %cst_43 [1] : vector<2x32xf32> to vector<2xf32>
    %203 = vector.shape_cast %202 : vector<2xf32> to vector<2x1xf32>
    %204 = vector.broadcast %3 : vector<1x1xf32> to vector<2x1xf32>
    %205 = arith.addf %203, %204 : vector<2x1xf32>
    %cst_44 = arith.constant 0.000000e+00 : f32
    %206 = vector.broadcast %cst_44 : f32 to vector<2x1xf32>
    %207 = arith.maximumf %205, %206 : vector<2x1xf32>
    %208 = arith.maximumf %181, %207 : vector<2x1xf32>
    %209 = arith.subf %181, %208 : vector<2x1xf32>
    %210 = math.exp %209 : vector<2x1xf32>
    %211 = arith.subf %207, %208 : vector<2x1xf32>
    %212 = math.exp %211 : vector<2x1xf32>
    %213 = arith.mulf %210, %187 : vector<2x1xf32>
    %214 = arith.addf %213, %212 : vector<2x1xf32>
    %215 = vector.broadcast %210 : vector<2x1xf32> to vector<2x32xf32>
    %216 = arith.mulf %215, %192 : vector<2x32xf32>
    %217 = vector.broadcast %212 : vector<2x1xf32> to vector<2x32xf32>
    %218 = arith.mulf %217, %199 : vector<2x32xf32>
    %219 = arith.addf %216, %218 : vector<2x32xf32>
    %220 = tpu.reciprocal %214 {approx = true} : vector<2x1xf32> -> vector<2x1xf32>
    %221 = vector.broadcast %220 : vector<2x1xf32> to vector<2x32xf32>
    %222 = arith.mulf %219, %221 : vector<2x32xf32>
    %cst_45 = arith.constant dense<0.000000e+00> : vector<2x64xf32>
    %223 = tpu.matmul %222, %7, %cst_45 {dimension_numbers = #tpu.dot_dimension_numbers<[1], [0], [0], [1], [0, 0, 1, 1], [], []>} : vector<2x32xf32>, vector<32x64xf32>, vector<2x64xf32> -> vector<2x64xf32>
    %224 = vector.broadcast %4 : vector<1x64xf32> to vector<2x64xf32>
    %225 = arith.addf %223, %224 : vector<2x64xf32>
    %cst_46 = arith.constant 0.000000e+00 : f32
    %226 = vector.broadcast %cst_46 : f32 to vector<2x64xf32>
    %227 = arith.maximumf %225, %226 : vector<2x64xf32>
    %cst_47 = arith.constant dense<0.000000e+00> : vector<2x128xf32>
    %228 = tpu.matmul %227, %8, %cst_47 {dimension_numbers = #tpu.dot_dimension_numbers<[1], [0], [0], [1], [0, 0, 1, 1], [], []>} : vector<2x64xf32>, vector<64x128xf32>, vector<2x128xf32> -> vector<2x128xf32>
    %229 = vector.broadcast %5 : vector<1x128xf32> to vector<2x128xf32>
    %230 = arith.addf %228, %229 : vector<2x128xf32>
    %c0_48 = arith.constant 0 : index
    %c0_49 = arith.constant 0 : index
    %231 = vector.load %arg2[%c0_48, %c0_49] : memref<2x128xf32, #tpu.memory_space<vmem>>, vector<2x128xf32>
    tpu.vector_store %arg2[%c0_48, %c0_49], %230 {strides = array<i32>} : memref<2x128xf32, #tpu.memory_space<vmem>>, vector<2x128xf32>,
    return
  }
}

</mosaic_0001>

<bundles_post_ra>
// kernel: shared_mlp_over_rnn.1
= control target key start
LH: loop header
LB: loop body
LE: loop exit
PB: predicated region body
PF: predicated region fallthrough
CT: control target
= control target key end

     0   :  { %7 = vsyncpa [#allocation3], 0  ;;  %s1518_s0 = inlined_call_operand.vmem [shape: f32[16,8], index: 0, kind: input, shape index: {}]   ;;  %s1519_s1 = inlined_call_operand.hbm [shape: f32[144,128], index: 1, kind: input, shape index: {}]   ;;  %s1520_s2 = inlined_call_operand.hbm [shape: f32[2,128], index: 2, kind: output, shape index: {}]  }
   0x1   :  { %8 = vsyncpa [#allocation4], 0  ;;  %s1256_s9 = smov [#allocation2]  }
   0x2   :  { %s16_s10 = sshll.u32 %s1256_s9, 4  ;;  %s17_s10 = int_to_ptr.vmem [resolvable:$true] %s16_s10 }
   0x3   :  { %s1220_s11 = scalar_lea.vmem %s17_s10, 2304  ;;  %p1225_p1 = scmp.lt.s32.totalorder %s17_s10, %s17_s10 }
   0x4   :  { %p1221_p0 = scmp.ne.s32.totalorder %s17_s10, %s1220_s11  ;;  %p1226_p2 = scmp.lt.s32.totalorder %s1220_s11, %s1220_s11 }
   0x6   :  { %p1227_p3 = por %p1226_p2, %p1225_p1 }
   0x8   :  { %p1228_p4 = pnand %p1227_p3, %p1221_p0 }
   0xa   :  { %1231 = shalt.err (!%p1228_p4)
}
   0xb   :  { %s1257_s12 = smov 128   ;;  %s1258_s13 = smov 8  }
   0xc   :  { %22 = dma.hbm_to_vmem [thread:$0]  %s1519_s1, 2304, %s17_s10, [#allocation3], %s1257_s12, %s1257_s12, %s1258_s13  }
   0xd   :  { %1252 = dma.done.wait [#allocation3], 2304  }
   0xe   :  { %1253 = vsyncadd [#allocation3], 4294964992  ;;  %v1259_v0 = vmov 0.0   ;;  %vm1260_vm0 = vmmov 0   ;;  %v1261_v1 = vmov 0   ;;  %vm55_vm1 = vcmask 64512  }
   0xf   :  { %1071 = vmatprep.subr.bf16.mxu0 %v1259_v0  ;;  %1075 = vmatprep.mubr.msk.bf16.mxu0 %vm1260_vm0, %v1259_v0  ;;  %v27_v2 = vld [vmem:[#allocation2] sm:$0xff]  ;;  %v50_v4 = vld [vmem:[%s1518_s0 + $0x8] sm:$0xff]  ;;  %v33_v7 = vld [vmem:[#allocation2 + $0x10] sm:$0xff]  ;;  %vm139_vm2 = vcmask 261120   ;;  %vm252_vm3 = vcmask 257026   ;;  %vm191_vm4 = vcmask 254976  }
  0x10   :  { %1164 = vset.pattern.permute.xlu0 %v1261_v1  ;;  %1165 = vset.pattern.permute.xlu1 %v1261_v1  ;;  %v49_v3 = vld [vmem:[%s1518_s0] sm:$0xff]  ;;  %v36_v6 = vld [vmem:[#allocation2 + $0x28] sm:$0xff]  ;;  %v34_v9 = vld [vmem:[#allocation2 + $0x18] sm:$0xff]  ;;  %vm343_vm5 = vcmask 259076   ;;  %vm435_vm6 = vcmask 261126   ;;  %vm911_vm7 = vcmask 523264  }
  0x11   :  { %1058 = vmatprep.subr.mxu1 %v27_v2  ;;  %1060 = vmatprep.mubr.msk.f32.mxu1 %vm55_vm1, %v49_v3  ;;  %v35_v5 = vld [vmem:[#allocation2 + $0x20] sm:$0xff]  ;;  %v1294_v10 = vpack.c.bf16 %v34_v9, %v33_v7  ;;  %v1001_v11 = vld [vmem:[#allocation2 + $0x8] ss:$0 sm:$0xff]  ;;  %v1334_v33 = vld [vmem:[#allocation2 + $0x9] ss:$0 sm:$0xff]  ;;  %s1262_s0 = smov [#allocation5]  }
  0x12   :  { %1059 = vmatpush3.msra.mxu1 %v27_v2  ;;  %v1290_v8 = vpack.c.bf16 %v36_v6, %v35_v5  ;;  %s992_s19 = sshll.u32 %s1262_s0, 4  ;;  %s993_s19 = int_to_ptr.vmem [resolvable:$true] %s992_s19 }
  0x13   :  { %1061 = vmatmul.mubr.msk.f32.vlgmr.msra.gmra.mxu1 %vm55_vm1, %v50_v4  ;;  %1063 = vmatprep.subr.bf16.mxu1 %v1259_v0  ;;  %s1232_s20 = scalar_lea.vmem %s993_s19, 32  ;;  %p1237_p6 = scmp.lt.s32.totalorder %s993_s19, %s993_s19 }
  0x14   :  { %1064 = vmatpush3.bf16.msra.mxu1 %v1290_v8  ;;  %1067 = vmatprep.mubr.msk.bf16.mxu1 %vm1260_vm0, %v1259_v0  ;;  %p1233_p5 = scmp.ne.s32.totalorder %s993_s19, %s1232_s20  ;;  %p1238_p7 = scmp.lt.s32.totalorder %s1232_s20, %s1232_s20 }
  0x15   :  { %1065 = vmatprep.subr.bf16.mxu1 %v1259_v0  ;;  %1072 = vmatpush3.bf16.msra.mxu0 %v1290_v8 }
  0x16   :  { %1073 = vmatprep.subr.bf16.mxu0 %v1259_v0  ;;  %p1239_p8 = por %p1238_p7, %p1237_p6 }
  0x18   :  { %1066 = vmatpush3.bf16.msra.mxu1 %v1294_v10  ;;  %p1240_p9 = pnand %p1239_p8, %p1233_p5 }
  0x19   :  { %1074 = vmatpush3.bf16.msra.mxu0 %v1294_v10  ;;  %1079 = vmatprep.subr.bf16.mxu1 %v1259_v0 }
  0x1a   :  { %1087 = vmatprep.subr.bf16.mxu0 %v1259_v0 }
  0x1b   :  { %1068 = vmatmul.mubr.bf16.vlgmr.msra.gmra.mxu1 %v1261_v1 }
  0x1c   :  { %1080 = vmatpush3.bf16.msra.mxu1 %v1290_v8  ;;  %1083 = vmatprep.mubr.msk.bf16.mxu1 %vm1260_vm0, %v1259_v0 }
  0x1d   :  { %1081 = vmatprep.subr.bf16.mxu1 %v1259_v0 }
  0x20   :  { %1082 = vmatpush3.bf16.msra.mxu1 %v1294_v10 }
  0x21   :  { %1095 = vmatprep.subr.bf16.mxu1 %v1259_v0 }
  0xd3   :  { %v1062_v12 = vpop.f32.mrf.mxu1 }
  0xd4   :  { %v1311_v13 = vadd.f32 %v1062_v12, %v1001_v11 }
  0xd5   :  { %v128_v14 = vpop.f32.mrf.mxu1 }
  0xd6   :  { %v1313_v15 = vadd.f32 %v1001_v11, %v128_v14 }
  0xdb   :  { %v177_v16 = vpop.f32.mrf.mxu1 }
  0xdc   :  { %v183_v17 = vadd.f32 %v177_v16, %v1313_v15 }
  0xdd   :  { %v1069_v18 = vpop.f32.mrf.mxu1 }
  0xde   :  { %1166 = vtanh.f32 %v183_v17 }
  0xdf   :  { %v180_v19 = vpop.f32.mrf.mxu1 }
  0xe1   :  { %v1070_v20 = vpop.f32.mrf.mxu1 }
  0xeb   :  { %v1316_v21 = vpop.eup %1166 }
  0xec   :  { %v201_v22 = vpack.c.bf16 %v1316_v21, %v1316_v21  ;;  %v185_v32 = vmax.f32 %v1316_v21, 0.0 }
  0xee   :  { %1076 = vmatmul.mubr.msk.bf16.vlgmr.msra.gmra.mxu0 %vm139_vm2, %v201_v22  ;;  %v190_v37 = vmul.f32 %v1334_v33, %v185_v32 }
  0xef   :  { %1088 = vmatpush3.bf16.msra.mxu0 %v1290_v8  ;;  %1091 = vmatprep.mubr.msk.bf16.mxu0 %vm1260_vm0, %v1259_v0 }
  0xf0   :  { %1089 = vmatprep.subr.bf16.mxu0 %v1259_v0  ;;  %v192_v38 = vsel %vm191_vm4, %v190_v37, 0.0 }
  0xf3   :  { %1090 = vmatpush3.bf16.msra.mxu0 %v1294_v10 }
  0xf4   :  { %1103 = vmatprep.subr.bf16.mxu0 %v1259_v0 }
 0x1ae   :  { %v239_v23 = vpop.f32.mrf.mxu0 }
 0x1af   :  { %v246_v24 = vrot.slane %v239_v23, 6 }
 0x1b0   :  { %v1077_v25 = vpop.f32.mrf.mxu0 }
 0x1b1   :  { %v248_v26 = vadd.f32 %v246_v24, %v1313_v15 }
 0x1b2   :  { %v242_v27 = vpop.f32.mrf.mxu0 }
 0x1b3   :  { %1168 = vtanh.f32 %v248_v26 }
 0x1b4   :  { %v1078_v28 = vpop.f32.mrf.mxu0 }
 0x1c0   :  { %v1328_v29 = vpop.eup %1168 }
 0x1c1   :  { %v290_v30 = vpack.c.bf16 %v1328_v29, %v1328_v29  ;;  %v250_v31 = vmax.f32 %v1328_v29, 0.0 }
 0x1c3   :  { %v292_v34 = vrot.slane %v290_v30, 1  ;;  %v251_v35 = vmul.f32 %v1334_v33, %v250_v31  ;;  %v1415_v30 = vld [vmem:[#allocation2 + $0xa] ss:$0 sm:$0xff] }
 0x1c5   :  { %1084 = vmatmul.mubr.msk.bf16.vlgmr.msra.gmra.mxu1 %vm139_vm2, %v292_v34  ;;  %v253_v36 = vsel %vm252_vm3, %v251_v35, 0.0 }
 0x1c6   :  { %254 = vadd.xlane.f32.xlu0 %v253_v36  ;;  %1096 = vmatpush3.bf16.msra.mxu1 %v1290_v8 }
 0x1c7   :  { %1097 = vmatprep.subr.bf16.mxu1 %v1259_v0  ;;  %1099 = vmatprep.mubr.msk.bf16.mxu1 %vm1260_vm0, %v1259_v0 }
 0x1ca   :  { %193 = vadd.xlane.f32.xlu0 %v192_v38  ;;  %1098 = vmatpush3.bf16.msra.mxu1 %v1294_v10 }
 0x1cb   :  { %1111 = vmatprep.subr.bf16.mxu1 %v1259_v0 }
 0x24f   :  { %v255_v24 = vpop.xlane.xlu0 %254 }
 0x250   :  { %v256_v38 = vadd.f32 %v1415_v30, %v255_v24 }
 0x253   :  { %v194_v36 = vpop.xlane.xlu0 %193 }
 0x285   :  { %v330_v39 = vpop.f32.mrf.mxu1 }
 0x286   :  { %v337_v40 = vrot.slane %v330_v39, 4 }
 0x287   :  { %v1085_v41 = vpop.f32.mrf.mxu1 }
 0x288   :  { %v339_v42 = vadd.f32 %v337_v40, %v1313_v15  ;;  %v199_v41 = vadd.f32 %v1415_v30, %v194_v36 }
 0x289   :  { %v333_v43 = vpop.f32.mrf.mxu1 }
 0x28a   :  { %1170 = vtanh.f32 %v339_v42 }
 0x28b   :  { %v1086_v44 = vpop.f32.mrf.mxu1 }
 0x28c   :  { %v257_v44 = vmax.f32 %v256_v38, 0.0 }
 0x297   :  { %v1352_v45 = vpop.eup %1170 }
 0x298   :  { %v382_v46 = vpack.c.bf16 %v1352_v45, %v1352_v45  ;;  %v341_v47 = vmax.f32 %v1352_v45, 0.0 }
 0x29a   :  { %v384_v48 = vrot.slane %v382_v46, 2  ;;  %v342_v49 = vmul.f32 %v1334_v33, %v341_v47 }
 0x29c   :  { %1092 = vmatmul.mubr.msk.bf16.vlgmr.msra.gmra.mxu0 %vm139_vm2, %v384_v48  ;;  %v344_v50 = vsel %vm343_vm5, %v342_v49, 0.0  ;;  %v200_v49 = vmax.f32 %v199_v41, 0.0 }
 0x29d   :  { %345 = vadd.xlane.f32.xlu1 %v344_v50  ;;  %1104 = vmatpush3.bf16.msra.mxu0 %v1290_v8 }
 0x29e   :  { %1105 = vmatprep.subr.bf16.mxu0 %v1259_v0  ;;  %1107 = vmatprep.mubr.msk.bf16.mxu0 %vm1260_vm0, %v1259_v0 }
 0x2a1   :  { %1106 = vmatpush3.bf16.msra.mxu0 %v1294_v10 }
 0x2a2   :  { %1119 = vmatprep.subr.bf16.mxu0 %v1259_v0 }
 0x326   :  { %v346_v26 = vpop.xlane.xlu1 %345 }
 0x327   :  { %v1420_v39 = vadd.f32 %v1415_v30, %v346_v26 }
 0x329   :  { %v348_v46 = vmax.f32 %v1420_v39, 0.0 }
 0x35c   :  { %v422_v51 = vpop.f32.mrf.mxu0 }
 0x35d   :  { %v429_v52 = vrot.slane %v422_v51, 2 }
 0x35e   :  { %v1093_v53 = vpop.f32.mrf.mxu0 }
 0x35f   :  { %v431_v54 = vadd.f32 %v429_v52, %v1313_v15  ;;  %v259_v52 = vrot.slane %v257_v44, 2  ;;  %v350_v53 = vrot.slane %v348_v46, 4 }
 0x360   :  { %v425_v55 = vpop.f32.mrf.mxu0 }
 0x361   :  { %1172 = vtanh.f32 %v431_v54  ;;  %v261_v55 = vmax.f32 %v200_v49, %v259_v52 }
 0x362   :  { %v1094_v56 = vpop.f32.mrf.mxu0 }
 0x36e   :  { %v1369_v57 = vpop.eup %1172 }
 0x36f   :  { %v474_v58 = vpack.c.bf16 %v1369_v57, %v1369_v57  ;;  %v433_v59 = vmax.f32 %v1369_v57, 0.0 }
 0x371   :  { %v476_v60 = vrot.slane %v474_v58, 3  ;;  %v434_v61 = vmul.f32 %v1334_v33, %v433_v59 }
 0x373   :  { %1100 = vmatmul.mubr.msk.bf16.vlgmr.msra.gmra.mxu1 %vm139_vm2, %v476_v60  ;;  %v436_v62 = vsel %vm435_vm6, %v434_v61, 0.0  ;;  %v352_v61 = vmax.f32 %v261_v55, %v350_v53 }
 0x374   :  { %437 = vadd.xlane.f32.xlu1 %v436_v62  ;;  %1112 = vmatpush3.bf16.msra.mxu1 %v1290_v8 }
 0x375   :  { %1113 = vmatprep.subr.bf16.mxu1 %v1259_v0  ;;  %1115 = vmatprep.mubr.msk.bf16.mxu1 %vm1260_vm0, %v1259_v0 }
 0x378   :  { %1114 = vmatpush3.bf16.msra.mxu1 %v1294_v10 }
 0x379   :  { %1127 = vmatprep.subr.mxu1 %v1259_v0 }
 0x3fd   :  { %v438_v37 = vpop.xlane.xlu1 %437 }
 0x3fe   :  { %v1424_v42 = vadd.f32 %v1415_v30, %v438_v37 }
 0x400   :  { %v440_v50 = vmax.f32 %v1424_v42, 0.0 }
 0x402   :  { %v442_v56 = vrot.slane %v440_v50, 6 }
 0x433   :  { %v514_v63 = vpop.f32.mrf.mxu1 }
 0x434   :  { %v520_v1 = vadd.f32 %v514_v63, %v1311_v13 }
 0x435   :  { %v1101_v2 = vpop.f32.mrf.mxu1 }
 0x436   :  { %1174 = vtanh.f32 %v520_v1  ;;  %v266_v2 = vrot.slane %v261_v55, 6 }
 0x437   :  { %v517_v3 = vpop.f32.mrf.mxu1 }
 0x438   :  { %v444_v3 = vmax.f32 %v352_v61, %v442_v56 }
 0x439   :  { %v1102_v4 = vpop.f32.mrf.mxu1 }
 0x443   :  { %v1386_v5 = vpop.eup %1174 }
 0x444   :  { %v551_v6 = vpack.c.bf16 %v1386_v5, %v1386_v5  ;;  %v522_v7 = vmax.f32 %v1386_v5, 0.0 }
 0x446   :  { %1108 = vmatmul.mubr.msk.bf16.vlgmr.msra.gmra.mxu0 %vm139_vm2, %v551_v6  ;;  %v523_v9 = vmul.f32 %v1334_v33, %v522_v7 }
 0x447   :  { %1120 = vmatpush3.bf16.msra.mxu0 %v1290_v8  ;;  %1123 = vmatprep.mubr.msk.bf16.mxu0 %vm1260_vm0, %v1259_v0 }
 0x448   :  { %v524_v11 = vsel %vm191_vm4, %v523_v9, 0.0  ;;  %1121 = vmatprep.subr.bf16.mxu0 %v1259_v0 }
 0x449   :  { %525 = vadd.xlane.f32.xlu0 %v524_v11 }
 0x44b   :  { %1122 = vmatpush3.bf16.msra.mxu0 %v1294_v10 }
 0x44c   :  { %1138 = vmatprep.subr.mxu0 %v1259_v0 }
 0x4d2   :  { %v526_v48 = vpop.xlane.xlu0 %525 }
 0x4d3   :  { %v1432_v54 = vadd.f32 %v1415_v30, %v526_v48 }
 0x4d5   :  { %v528_v62 = vmax.f32 %v1432_v54, 0.0 }
 0x4d7   :  { %v529_v11 = vmax.f32 %v444_v3, %v528_v62 }
 0x506   :  { %v589_v12 = vpop.f32.mrf.mxu0 }
 0x507   :  { %v596_v14 = vrot.slane %v589_v12, 6 }
 0x508   :  { %v1109_v15 = vpop.f32.mrf.mxu0 }
 0x509   :  { %v598_v16 = vadd.f32 %v596_v14, %v1311_v13  ;;  %v268_v14 = vsub.f32 %v257_v44, %v266_v2  ;;  %v357_v44 = vrot.slane %v352_v61, 4 }
 0x50a   :  { %v592_v17 = vpop.f32.mrf.mxu0 }
 0x50b   :  { %1176 = vtanh.f32 %v598_v16  ;;  %v269_v16 = vmul.f32 1.442695, %v268_v14  ;;  %v359_v56 = vsub.f32 %v348_v46, %v357_v44 }
 0x50c   :  { %v1110_v8 = vpop.f32.mrf.mxu0 }
 0x50d   :  { %v360_v2 = vmul.f32 1.442695, %v359_v56 }
 0x518   :  { %v1403_v18 = vpop.eup %1176 }
 0x519   :  { %v640_v19 = vpack.c.bf16 %v1403_v18, %v1403_v18  ;;  %v600_v20 = vmax.f32 %v1403_v18, 0.0 }
 0x51b   :  { %v642_v22 = vrot.slane %v640_v19, 1  ;;  %v601_v10 = vmul.f32 %v1334_v33, %v600_v20 }
 0x51d   :  { %1116 = vmatmul.mubr.msk.bf16.vlgmr.msra.gmra.mxu1 %vm139_vm2, %v642_v22  ;;  %v602_v23 = vsel %vm252_vm3, %v601_v10, 0.0 }
 0x51e   :  { %603 = vadd.xlane.f32.xlu1 %v602_v23  ;;  %1135 = vmatprep.mubr.msk.f32.mxu1 %vm1260_vm0, %v1259_v0 }
 0x5a7   :  { %v604_v43 = vpop.xlane.xlu1 %603 }
 0x5a8   :  { %v1429_v51 = vadd.f32 %v1415_v30, %v604_v43  ;;  %v262_v43 = vsub.f32 %v200_v49, %v261_v55 }
 0x5aa   :  { %v606_v58 = vmax.f32 %v1429_v51, 0.0  ;;  %v263_v53 = vmul.f32 1.442695, %v262_v43 }
 0x5ac   :  { %v608_v4 = vrot.slane %v606_v58, 2 }
 0x5ae   :  { %v610_v15 = vmax.f32 %v529_v11, %v608_v4  ;;  %v449_v4 = vrot.slane %v444_v3, 2 }
 0x5b0   :  { %v611_v17 = vsub.f32 %v529_v11, %v610_v15  ;;  %v451_v49 = vsub.f32 %v440_v50, %v449_v4 }
 0x5b2   :  { %v612_v8 = vmul.f32 1.442695, %v611_v17  ;;  %v615_v17 = vrot.slane %v610_v15, 6 }
 0x5b4   :  { %v617_v42 = vsub.f32 %v606_v58, %v615_v17 }
 0x5dd   :  { %v680_v25 = vpop.f32.mrf.mxu1 }
 0x5de   :  { %v687_v27 = vrot.slane %v680_v25, 4 }
 0x5df   :  { %v1117_v28 = vpop.f32.mrf.mxu1 }
 0x5e0   :  { %v689_v34 = vadd.f32 %v687_v27, %v1311_v13 }
 0x5e1   :  { %v683_v35 = vpop.f32.mrf.mxu1 }
 0x5e2   :  { %1178 = vtanh.f32 %v689_v34 }
 0x5e3   :  { %v1118_v40 = vpop.f32.mrf.mxu1  ;;  %1180 = vpow2.f32 %v269_v16 }
 0x5e4   :  { %1182 = vpow2.f32 %v612_v8 }
 0x5ef   :  { %v1437_v60 = vpop.eup %1178 }
 0x5f0   :  { %v731_v63 = vpack.c.bf16 %v1437_v60, %v1437_v60  ;;  %v691_v1 = vmax.f32 %v1437_v60, 0.0  ;;  %v1454_v19 = vpop.eup %1180  ;;  %v42_v60 = vld [vmem:[#allocation2 + $0x58] sm:$0xff] }
 0x5f1   :  { %v1457_v22 = vpop.eup %1182 }
 0x5f2   :  { %v733_v6 = vrot.slane %v731_v63, 2  ;;  %v692_v9 = vmul.f32 %v1334_v33, %v691_v1 }
 0x5f4   :  { %1124 = vmatmul.mubr.msk.bf16.vlgmr.msra.gmra.mxu0 %vm139_vm2, %v733_v6  ;;  %v693_v12 = vsel %vm343_vm5, %v692_v9, 0.0  ;;  %v445_v9 = vsub.f32 %v352_v61, %v444_v3 }
 0x5f5   :  { %694 = vadd.xlane.f32.xlu0 %v693_v12  ;;  %1154 = vmatprep.mubr.msk.f32.mxu0 %vm1260_vm0, %v1259_v0  ;;  %v452_v12 = vmul.f32 1.442695, %v451_v49 }
 0x5f6   :  { %v446_v14 = vmul.f32 1.442695, %v445_v9 }
 0x60b   :  { %282 = vperm.xlu0 %1164, %v1454_v19  }
 0x60f   :  { %627 = vperm.xlu0 %1164, %v1457_v22  }
 0x67e   :  { %v695_v10 = vpop.xlane.xlu0 %694 }
 0x67f   :  { %v696_v23 = vadd.f32 %v1415_v30, %v695_v10 }
 0x681   :  { %v697_v24 = vmax.f32 %v696_v23, 0.0 }
 0x683   :  { %v699_v25 = vrot.slane %v697_v24, 4 }
 0x685   :  { %v1461_v26 = vmax.f32 %v610_v15, %v699_v25 }
 0x687   :  { %v702_v27 = vsub.f32 %v610_v15, %v1461_v26  ;;  %v706_v50 = vrot.slane %v1461_v26, 4 }
 0x689   :  { %v703_v28 = vmul.f32 1.442695, %v702_v27  ;;  %v708_v23 = vsub.f32 %v697_v24, %v706_v50  ;;  %v47_v50 = vld [vmem:[#allocation2 + $0x80] sm:$0xff] }
 0x68b   :  { %1184 = vpow2.f32 %v703_v28  ;;  %v709_v54 = vmul.f32 1.442695, %v708_v23  ;;  %v272_v28 = vrot.slane %v1454_v19, 2  ;;  %v45_v23 = vld [vmem:[#allocation2 + $0x70] sm:$0xff] }
 0x698   :  { %v1464_v34 = vpop.eup %1184 }
 0x699   :  { %718 = vperm.xlu0 %1164, %v1464_v34  }
 0x6b4   :  { %v771_v35 = vpop.f32.mrf.mxu0 }
 0x6b5   :  { %v778_v36 = vrot.slane %v771_v35, 2 }
 0x6b6   :  { %v1125_v37 = vpop.f32.mrf.mxu0 }
 0x6b7   :  { %v780_v38 = vadd.f32 %v778_v36, %v1311_v13  ;;  %v353_v13 = vsub.f32 %v261_v55, %v352_v61  ;;  %v533_v55 = vsub.f32 %v528_v62, %v529_v11 }
 0x6b8   :  { %v774_v39 = vpop.f32.mrf.mxu0 }
 0x6b9   :  { %1186 = vtanh.f32 %v780_v38  ;;  %v354_v6 = vmul.f32 1.442695, %v353_v13  ;;  %v534_v10 = vmul.f32 1.442695, %v533_v55 }
 0x6ba   :  { %v1126_v40 = vpop.f32.mrf.mxu0  ;;  %1188 = vpow2.f32 %v263_v53 }
 0x6bb   :  { %1190 = vpow2.f32 %v360_v2 }
 0x6bc   :  { %1192 = vpow2.f32 %v354_v6 }
 0x6bd   :  { %1194 = vpow2.f32 %v452_v12 }
 0x6be   :  { %1196 = vpow2.f32 %v446_v14 }
 0x6c6   :  { %v1468_v41 = vpop.eup %1186 }
 0x6c7   :  { %v782_v48 = vmax.f32 %v1468_v41, 0.0  ;;  %v1189_v16 = vpop.eup %1188  ;;  %v1013_v41 = vld [vmem:[#allocation2 + $0xb] ss:$0 sm:$0xff] }
 0x6c8   :  { %v1191_v8 = vpop.eup %1190  ;;  %v274_v36 = vadd.f32 %v1189_v16, %v272_v28 }
 0x6c9   :  { %v783_v52 = vmul.f32 %v1334_v33, %v782_v48  ;;  %v530_v33 = vsub.f32 %v444_v3, %v529_v11  ;;  %v1193_v61 = vpop.eup %1192  ;;  %v618_v3 = vmul.f32 1.442695, %v617_v42  ;;  %v364_v37 = vrot.slane %v1191_v8, 4 }
 0x6ca   :  { %v1195_v25 = vpop.eup %1194  ;;  %v362_v39 = vmul.f32 %v1193_v61, %v274_v36 }
 0x6cb   :  { %v784_v63 = vsel %vm435_vm6, %v783_v52, 0.0  ;;  %v531_v46 = vmul.f32 1.442695, %v530_v33  ;;  %v1197_v62 = vpop.eup %1196  ;;  %v456_v44 = vrot.slane %v1195_v25, 6 }
 0x6cc   :  { %785 = vadd.xlane.f32.xlu1 %v784_v63  ;;  %v366_v43 = vadd.f32 %v364_v37, %v362_v39 }
 0x6cd   :  { %1198 = vpow2.f32 %v531_v46  ;;  %v39_v46 = vld [vmem:[#allocation2 + $0x40] sm:$0xff] }
 0x6ce   :  { %1200 = vpow2.f32 %v534_v10  ;;  %v454_v56 = vmul.f32 %v1197_v62, %v366_v43  ;;  %v38_v10 = vld [vmem:[#allocation2 + $0x38] sm:$0xff] }
 0x6cf   :  { %1202 = vpow2.f32 %v618_v3  ;;  %v46_v3 = vld [vmem:[#allocation2 + $0x78] sm:$0xff] }
 0x6d0   :  { %1204 = vpow2.f32 %v709_v54  ;;  %v458_v2 = vadd.f32 %v456_v44, %v454_v56 }
 0x6da   :  { %v1199_v11 = vpop.eup %1198 }
 0x6db   :  { %v1201_v15 = vpop.eup %1200  ;;  %v536_v4 = vmul.f32 %v1199_v11, %v458_v2 }
 0x6dc   :  { %v1203_v51 = vpop.eup %1202 }
 0x6dd   :  { %277 = vperm.xlu1 %1165, %v1189_v16   ;;  %v1205_v58 = vpop.eup %1204  ;;  %v622_v6 = vrot.slane %v1203_v51, 2 }
 0x6de   :  { %v713_v12 = vrot.slane %v1205_v58, 4 }
 0x6e1   :  { %374 = vperm.xlu1 %1165, %v1191_v8  }
 0x6e5   :  { %369 = vperm.xlu1 %1165, %v1193_v61  }
 0x6e9   :  { %466 = vperm.xlu1 %1165, %v1195_v25   ;;  %v44_v25 = vld [vmem:[#allocation2 + $0x68] sm:$0xff] }
 0x6ed   :  { %461 = vperm.xlu1 %1165, %v1197_v62  }
 0x6f1   :  { %540 = vperm.xlu1 %1165, %v1199_v11  }
 0x6f5   :  { %546 = vperm.xlu1 %1165, %v1201_v15  }
 0x6f9   :  { %632 = vperm.xlu1 %1165, %v1203_v51   ;;  %v283_v51 = vpop.permute.xlu0 %282 }
 0x6fd   :  { %723 = vperm.xlu1 %1165, %v1205_v58   ;;  %v285_v58 = vmul.f32 %v283_v51, %v250_v31 }
 0x755   :  { %v786_v27 = vpop.xlane.xlu1 %785 }
 0x756   :  { %v787_v24 = vadd.f32 %v1415_v30, %v786_v27  ;;  %v537_v30 = vadd.f32 %v1201_v15, %v536_v4 }
 0x758   :  { %v788_v35 = vmax.f32 %v787_v24, 0.0  ;;  %v620_v49 = vmul.f32 %v1457_v22, %v537_v30  ;;  %v37_v22 = vld [vmem:[#allocation2 + $0x30] sm:$0xff]  ;;  %v287_v24 = vrot.slane %v285_v58, 2 }
 0x759   :  { %v278_v54 = vpop.permute.xlu1 %277 }
 0x75a   :  { %v790_v38 = vrot.slane %v788_v35, 6  ;;  %v624_v9 = vadd.f32 %v622_v6, %v620_v49  ;;  %v280_v28 = vmul.f32 %v278_v54, %v185_v32 }
 0x75c   :  { %v792_v40 = vmax.f32 %v1461_v26, %v790_v38  ;;  %v711_v14 = vmul.f32 %v1464_v34, %v624_v9  ;;  %v48_v34 = vld [vmem:[#allocation2 + $0x88] sm:$0xff]  ;;  %v289_v36 = vadd.f32 %v287_v24, %v280_v28 }
 0x75d   :  { %1139 = vmatpush3.msra.mxu0 %v48_v34  ;;  %v375_v62 = vpop.permute.xlu1 %374 }
 0x75e   :  { %v793_v52 = vsub.f32 %v1461_v26, %v792_v40  ;;  %v797_v53 = vrot.slane %v792_v40, 2  ;;  %v715_v16 = vadd.f32 %v713_v12, %v711_v14  ;;  %v40_v26 = vld [vmem:[#allocation2 + $0x48] sm:$0xff]  ;;  %1140 = vmatprep.subr.mxu0 %v1259_v0 }
 0x75f   :  { %1128 = vmatpush3.msra.mxu1 %v40_v26  ;;  %1141 = vmatpush3.msra.mxu0 %v47_v50 }
 0x760   :  { %v794_v63 = vmul.f32 1.442695, %v793_v52  ;;  %v799_v13 = vsub.f32 %v788_v35, %v797_v53  ;;  %1129 = vmatprep.subr.mxu1 %v1259_v0  ;;  %1142 = vmatprep.subr.mxu0 %v1259_v0  ;;  %v377_v35 = vmul.f32 %v375_v62, %v341_v47 }
 0x761   :  { %1130 = vmatpush3.msra.mxu1 %v39_v46  ;;  %1143 = vmatpush3.msra.mxu0 %v46_v3  ;;  %v370_v11 = vpop.permute.xlu1 %369 }
 0x762   :  { %1206 = vpow2.f32 %v794_v63  ;;  %v800_v19 = vmul.f32 1.442695, %v799_v13  ;;  %1131 = vmatprep.subr.mxu1 %v1259_v0  ;;  %1144 = vmatprep.subr.mxu0 %v1259_v0  ;;  %v372_v38 = vmul.f32 %v370_v11, %v289_v36  ;;  %v379_v39 = vrot.slane %v377_v35, 4  ;;  %v628_v63 = vpop.permute.xlu0 %627 }
 0x763   :  { %1132 = vmatpush3.msra.mxu1 %v38_v10  ;;  %1145 = vmatpush3.msra.mxu0 %v45_v23 }
 0x764   :  { %1208 = vpow2.f32 %v800_v19  ;;  %1133 = vmatprep.subr.mxu1 %v1259_v0  ;;  %1146 = vmatprep.subr.mxu0 %v1259_v0  ;;  %v381_v43 = vadd.f32 %v379_v39, %v372_v38 }
 0x765   :  { %1134 = vmatpush3.msra.mxu1 %v37_v22  ;;  %1147 = vmatpush3.msra.mxu0 %v44_v25  ;;  %v467_v15 = vpop.permute.xlu1 %466 }
 0x766   :  { %1148 = vmatprep.subr.mxu0 %v1259_v0  ;;  %v469_v40 = vmul.f32 %v467_v15, %v433_v59  ;;  %v719_v4 = vpop.permute.xlu0 %718 }
 0x768   :  { %v471_v29 = vrot.slane %v469_v40, 6 }
 0x769   :  { %v462_v27 = vpop.permute.xlu1 %461 }
 0x76a   :  { %v464_v52 = vmul.f32 %v462_v27, %v381_v43 }
 0x76c   :  { %v473_v31 = vadd.f32 %v471_v29, %v464_v52 }
 0x76d   :  { %v541_v37 = vpop.permute.xlu1 %540 }
 0x76e   :  { %v543_v32 = vmul.f32 %v541_v37, %v473_v31 }
 0x76f   :  { %v1207_v33 = vpop.eup %1206 }
 0x770   :  { %809 = vperm.xlu0 %1164, %v1207_v33   ;;  %v802_v17 = vmul.f32 %v1207_v33, %v715_v16  ;;  %v43_v33 = vld [vmem:[#allocation2 + $0x60] sm:$0xff] }
 0x771   :  { %v1209_v55 = vpop.eup %1208  ;;  %v547_v44 = vpop.permute.xlu1 %546  ;;  %1149 = vmatpush3.msra.mxu0 %v43_v33 }
 0x772   :  { %v804_v8 = vrot.slane %v1209_v55, 6  ;;  %814 = vperm.xlu1 %1165, %v1209_v55   ;;  %v549_v21 = vmul.f32 %v547_v44, %v522_v7  ;;  %1150 = vmatprep.subr.mxu0 %v1259_v0  ;;  %v1015_v55 = vld [vmem:[#allocation2 + $0xc] ss:$0 sm:$0xff] }
 0x773   :  { %1151 = vmatpush3.msra.mxu0 %v42_v60 }
 0x774   :  { %v806_v42 = vadd.f32 %v804_v8, %v802_v17  ;;  %v550_v47 = vadd.f32 %v549_v21, %v543_v32  ;;  %1152 = vmatprep.subr.mxu0 %v1259_v0 }
 0x775   :  { %v633_v53 = vpop.permute.xlu1 %632 }
 0x776   :  { %1210 = vrcp.f32 %v806_v42  ;;  %v635_v45 = vmul.f32 %v633_v53, %v600_v20  ;;  %v630_v2 = vmul.f32 %v628_v63, %v550_v47 }
 0x778   :  { %v637_v56 = vrot.slane %v635_v45, 2 }
 0x779   :  { %v724_v13 = vpop.permute.xlu1 %723 }
 0x77a   :  { %v639_v57 = vadd.f32 %v637_v56, %v630_v2  ;;  %v726_v59 = vmul.f32 %v724_v13, %v691_v1  ;;  %v41_v1 = vld [vmem:[#allocation2 + $0x50] sm:$0xff] }
 0x77b   :  { %1153 = vmatpush3.msra.mxu0 %v41_v1 }
 0x77c   :  { %v728_v30 = vrot.slane %v726_v59, 4  ;;  %v721_v6 = vmul.f32 %v719_v4, %v639_v57 }
 0x77e   :  { %v730_v49 = vadd.f32 %v728_v30, %v721_v6 }
 0x783   :  { %v1211_v61 = vpop.eup %1210 }
 0x784   :  { %825 = vperm.xlu1 %1165, %v1211_v61  }
 0x7eb   :  { %v810_v7 = vpop.permute.xlu0 %809 }
 0x7ec   :  { %v812_v20 = vmul.f32 %v810_v7, %v730_v49 }
 0x7ed   :  { %v815_v19 = vpop.permute.xlu1 %814 }
 0x7ee   :  { %v817_v5 = vmul.f32 %v815_v19, %v782_v48 }
 0x7f0   :  { %v819_v18 = vrot.slane %v817_v5, 6 }
 0x7f2   :  { %v821_v9 = vadd.f32 %v819_v18, %v812_v20 }
 0x7ff   :  { %v826_v12 = vpop.permute.xlu1 %825 }
 0x800   :  { %v828_v14 = vmul.f32 %v826_v12, %v821_v9 }
 0x802   :  { %1136 = vmatmul.mubr.msk.f32.vlgmr.msra.gmra.mxu1 %vm139_vm2, %v828_v14 }
 0x8c2   :  { %v902_v48 = vpop.f32.mrf.mxu1 }
 0x8c3   :  { %v903_v16 = vadd.f32 %v1013_v41, %v902_v48 }
 0x8c4   :  { %v1137_v26 = vpop.f32.mrf.mxu1 }
 0x8c5   :  { %v906_v46 = vmax.f32 %v903_v16, 0.0 }
 0x8c7   :  { %1155 = vmatmul.mubr.msk.f32.vlgmr.msra.gmra.mxu0 %vm911_vm7, %v906_v46 }
 0x987   :  { %v981_v17 = vpop.f32.mrf.mxu0 }
 0x988   :  { %v982_v8 = vadd.f32 %v1015_v55, %v981_v17 }
 0x989   :  { %v1156_v10 = vpop.f32.mrf.mxu0 }
 0x98a   :  { %985 = vst [vmem:[#allocation5] sm:$0x3] %v982_v8 }
 0x98b   :  { %1243 = shalt.err (!%p1240_p9)
}
 0x98c   :  { %995 = dma.vmem_to_hbm [thread:$0]  %s993_s19, 32, %s1520_s2, [#allocation4]  }
 0x98d   :  { %1254 = dma.done.wait [#allocation4], 32  }
 0x98e   :  { %1255 = vsyncadd [#allocation4], 4294967264 }
 0x98f   :  { %999 = vsyncpa [#allocation3], 1 }
 0x990   :  { %1000 = vsyncpa [#allocation4], 1 }

</bundles_post_ra>
